<compile_context>
chip_gen: v6e
topology: v6e:2x2x1
jax: 0.10.0
libtpu: 0.0.40
codegen_flags: <defaults>
</compile_context>

<pallas_src>
import functools

import jax
import jax.numpy as jnp
from jax import lax
from jax.experimental import pallas as pl
from jax.experimental.pallas import tpu as pltpu


# --------------------------- wrapper-side im2col -----------------------------
def im2col_3x3_lane_major(x, pad_value):
    """x: (N, C, H, W) -> (C*9, N*H*W) patches, 3x3 window, stride 1.

    Built directly in lane-major layout (K leading, pixels on the lane axis),
    so the wrapper never transposes the 9x-expanded patch tensor in HBM.
    """
    N, C, H, W = x.shape
    pv = jnp.asarray(pad_value).astype(x.dtype)
    xp = lax.pad(x, pv, [(0, 0, 0), (0, 0, 0), (1, 1, 0), (1, 1, 0)])
    rows = []
    for c in range(C):
        for dh in range(3):
            for dw in range(3):
                rows.append(xp[:, c, dh:dh + H, dw:dw + W])     # (N, H, W)
    return jnp.stack(rows, axis=0).reshape(C * 9, N * H * W)


def im2col_3x3_ref(x):
    """Reference layout: (N, C, H, W) -> (N, H*W, C*9), zero padded."""
    N, C, H, W = x.shape
    xp = jnp.pad(x, ((0, 0), (0, 0), (1, 1), (1, 1)))
    cols = []
    for c in range(C):
        for dh in range(3):
            for dw in range(3):
                cols.append(xp[:, c, dh:dh + H, dw:dw + W].reshape(N, H * W))
    return jnp.stack(cols, axis=-1)


# ------------------------------ Pallas kernel --------------------------------
def cf_kernel(xp_ref, sp_ref, wx_ref, bx_ref, ws_ref, bs_ref, wlin_ref,
              whead_ref, bhead_ref, out_ref, dsum_ref, pool_ref, *, HW):
    """Grid point (b, t): one pixel tile of batch element b.

    xp_ref   : (Kpad, T)   bf16  im2col patches of x, tile t of batch b
    sp_ref   : (Kpad, T)   bf16  im2col patches of src, tile t
    wx_ref   : (F+F2, Kpad) bf16 fused LPIPS/classifier conv weights (x path,
                                 possibly rescale-folded)
    bx_ref   : (F+F2, 1)   f32   biases (x path, possibly rescale-folded)
    ws_ref   : (F, Kpad)   bf16  LPIPS conv weights (src path, un-folded)
    bs_ref   : (F, 1)      f32
    wlin_ref : (F, 1)      f32   nonneg LPIPS 1x1 weights
    whead_ref: (NC, F2)    f32   classifier head (transposed)
    bhead_ref: (NC, 1)     f32
    out_ref  : (OUT_ROWS, 128) f32  column 0 = [lpips_b, logits_b..., 0...]
    dsum_ref : (F, 1)      f32   accumulator: sum over pixels of w-unweighted diff
    pool_ref : (F2, 1)     f32   accumulator: classifier GAP numerator
    """
    t = pl.program_id(1)
    nt = pl.num_programs(1)
    F = wlin_ref.shape[0]
    NC = whead_ref.shape[0]
    T = xp_ref.shape[1]
    out_rows = out_ref.shape[0]

    @pl.when(t == 0)
    def _():
        dsum_ref[...] = jnp.zeros_like(dsum_ref)
        pool_ref[...] = jnp.zeros_like(pool_ref)

    # conv-as-matmul for both nets (x path) and LPIPS net (src path), bf16 MXU
    # with f32 accumulation.
    fx = jnp.dot(wx_ref[...], xp_ref[...],
                 preferred_element_type=jnp.float32) + bx_ref[...]   # (F+F2, T)
    fx = jnp.maximum(fx, 0.0)
    fs = jnp.dot(ws_ref[...], sp_ref[...],
                 preferred_element_type=jnp.float32) + bs_ref[...]   # (F, T)
    fs = jnp.maximum(fs, 0.0)

    x_lp = fx[:F, :]        # (F,  T) LPIPS features of x
    x_cf = fx[F:, :]        # (F2, T) classifier features of x

    # per-pixel channel unit-norm (LPIPS normalize_tensor), rsqrt on the EUP
    eps = 1e-10
    xn = x_lp * lax.rsqrt(jnp.sum(x_lp * x_lp, axis=0, keepdims=True) + eps)
    sn = fs * lax.rsqrt(jnp.sum(fs * fs, axis=0, keepdims=True) + eps)
    d = xn - sn
    diff = d * d                                                     # (F, T)

    # pixel reductions on the MXU (lane dim is large, MXU has slack);
    # accumulate per-channel sums into tiny f32 scratch.
    ones_t = jnp.ones((T, 1), dtype=jnp.float32)
    dsum_ref[...] += jnp.dot(diff, ones_t, preferred_element_type=jnp.float32)
    pool_ref[...] += jnp.dot(x_cf, ones_t, preferred_element_type=jnp.float32)

    @pl.when(t == nt - 1)
    def _():
        inv_hw = 1.0 / HW
        # LPIPS: weighted channel sum of per-channel diff sums, spatial mean
        lp = jnp.sum(wlin_ref[...] * dsum_ref[...],
                     axis=0, keepdims=True) * inv_hw                 # (1, 1)
        # classifier: GAP -> linear head
        logits = jnp.dot(whead_ref[...], pool_ref[...] * inv_hw,
                         preferred_element_type=jnp.float32) + bhead_ref[...]  # (NC,1)
        parts = [lp, logits]
        pad_rows = out_rows - 1 - NC
        if pad_rows > 0:
            parts.append(jnp.zeros((pad_rows, 1), jnp.float32))
        col = jnp.concatenate(parts, axis=0)                         # (out_rows, 1)
        lane = lax.broadcasted_iota(jnp.int32, (out_rows, 128), 1)
        out_ref[...] = jnp.where(lane == 0, col, 0.0)                # one full store


# ------------------------------ wrapper --------------------------------------
@jax.jit
def counterfactual_forward(x, src_img, params):
    assert x.ndim == src_img.ndim, f'Invalid shapes: {src_img.shape} and {x.shape}'

    B, C, H, W = x.shape
    HW = H * W
    K = C * 9
    K_pad = ((K + 7) // 8) * 8

    F = params['w_lp'].shape[1]
    F2 = params['w_clf'].shape[1]
    NC = params['w_head'].shape[1]

    # [0,1] detection: read-only reduction over x (no elementwise rewrite pass)
    in_unit_range = jnp.logical_and(jnp.min(x) >= 0.0, jnp.max(x) <= 1.0)

    # fold x' = 2x - 1 into the x-path conv weights/bias.  Border pad value is
    # 0.5 when folding so padded taps still contribute 0 after the fold.
    w_cat = jnp.concatenate([params['w_lp'], params['w_clf']], axis=1)   # (K, F+F2)
    b_cat = jnp.concatenate([params['b_lp'], params['b_clf']], axis=1)   # (1, F+F2)
    scale = jnp.where(in_unit_range, 2.0, 1.0)
    wx = w_cat * scale
    bx = jnp.where(in_unit_range,
                   b_cat - jnp.sum(w_cat, axis=0, keepdims=True), b_cat)
    pad_val = jnp.where(in_unit_range, 0.5, 0.0)

    # lane-major bf16 patches (K on sublanes, pixels on lanes), K padded to 8
    xpt = im2col_3x3_lane_major(x.astype(jnp.bfloat16), pad_val)        # (K, B*HW)
    spt = im2col_3x3_lane_major(src_img.astype(jnp.bfloat16), 0.0)      # (K, HW)
    xpt = jnp.pad(xpt, ((0, K_pad - K), (0, 0)))
    spt = jnp.pad(spt, ((0, K_pad - K), (0, 0)))

    wx_t = jnp.pad(wx.T, ((0, 0), (0, K_pad - K))).astype(jnp.bfloat16)              # (F+F2, Kpad)
    bx_t = bx.T.astype(jnp.float32)                                                  # (F+F2, 1)
    ws_t = jnp.pad(params['w_lp'].T, ((0, 0), (0, K_pad - K))).astype(jnp.bfloat16)  # (F, Kpad)
    bs_t = params['b_lp'].T.astype(jnp.float32)                                      # (F, 1)
    w_lin = params['w_lin'].astype(jnp.float32)                                      # (F, 1)
    w_head_t = params['w_head'].T.astype(jnp.float32)                                # (NC, F2)
    b_head_t = params['b_head'].T.astype(jnp.float32)                                # (NC, 1)

    # pixel tile (lane) size: largest multiple of 128 that divides HW, <= 1024
    assert HW % 128 == 0, "H*W must be a multiple of 128 for this kernel"
    T = 128
    for cand in (1024, 512, 256, 128):
        if cand <= HW and HW % cand == 0:
            T = cand
            break
    num_t = HW // T
    out_rows = max(8, ((1 + NC + 7) // 8) * 8)

    out = pl.pallas_call(
        functools.partial(cf_kernel, HW=HW),
        out_shape=jax.ShapeDtypeStruct((B * out_rows, 128), jnp.float32),
        grid_spec=pltpu.PrefetchScalarGridSpec(
            num_scalar_prefetch=0,
            grid=(B, num_t),
            in_specs=[
                pl.BlockSpec((K_pad, T), lambda b, t: (0, b * num_t + t)),  # x patches
                pl.BlockSpec((K_pad, T), lambda b, t: (0, t)),              # src patches
                pl.BlockSpec((F + F2, K_pad), lambda b, t: (0, 0)),         # wx
                pl.BlockSpec((F + F2, 1), lambda b, t: (0, 0)),             # bx
                pl.BlockSpec((F, K_pad), lambda b, t: (0, 0)),              # ws (src)
                pl.BlockSpec((F, 1), lambda b, t: (0, 0)),                  # bs (src)
                pl.BlockSpec((F, 1), lambda b, t: (0, 0)),                  # w_lin
                pl.BlockSpec((NC, F2), lambda b, t: (0, 0)),                # w_head
                pl.BlockSpec((NC, 1), lambda b, t: (0, 0)),                 # b_head
            ],
            out_specs=pl.BlockSpec((out_rows, 128), lambda b, t: (b, 0)),
            scratch_shapes=[pltpu.VMEM((F, 1), jnp.float32),
                            pltpu.VMEM((F2, 1), jnp.float32)],
        ),
        compiler_params=pltpu.CompilerParams(
            dimension_semantics=("parallel", "arbitrary"),
            vmem_limit_bytes=32 * 1024 * 1024),
    )(xpt, spt, wx_t, bx_t, ws_t, bs_t, w_lin, w_head_t, b_head_t)

    out = out.reshape(B, out_rows, 128)
    lpips_out = out[:, 0, 0:1]            # batch_lpips.unsqueeze(1) -> (B, 1)
    predictions = out[:, 1:1 + NC, 0]     # (B, NC)
    return {'lpips': lpips_out, 'predictions': predictions}


# --------------------------- pure-JAX reference ------------------------------
def reference_forward(x, src_img, params):
    in_unit_range = jnp.logical_and(jnp.min(x) >= 0.0, jnp.max(x) <= 1.0)
    x = jnp.where(in_unit_range, (x - 0.5) * 2.0, x)
    xp = im2col_3x3_ref(x)
    sp = im2col_3x3_ref(src_img)

    xf = jnp.maximum(xp @ params['w_lp'] + params['b_lp'], 0.0)
    sf = jnp.maximum(sp @ params['w_lp'] + params['b_lp'], 0.0)
    eps = 1e-10
    xn = xf / jnp.sqrt(jnp.sum(xf * xf, axis=-1, keepdims=True) + eps)
    sn = sf / jnp.sqrt(jnp.sum(sf * sf, axis=-1, keepdims=True) + eps)
    diff = (xn - sn) ** 2
    lp = jnp.mean(diff @ params['w_lin'], axis=1)          # (B, 1)

    cf = jnp.maximum(xp @ params['w_clf'] + params['b_clf'], 0.0)
    pooled = jnp.mean(cf, axis=1)                          # (B, F2)
    logits = pooled @ params['w_head'] + params['b_head']  # (B, NC)
    return {'lpips': lp, 'predictions': logits}


# ------------------------------- main ----------------------------------------
if __name__ == "__main__":
    B, C, H, W = 2, 3, 16, 16
    F, F2, NC = 32, 32, 2
    K = C * 9

    key = jax.random.PRNGKey(0)
    k_x, k_src, k1, k2, k3, k4, k5, k6, k7 = jax.random.split(key, 9)

    # input batch in [0, 1] -> exercises the rescale branch
    x = jax.random.uniform(k_x, (B, C, H, W), dtype=jnp.float32)

    # synthetic "loaded" source image: [0,1] image mapped to [-1,1]
    src01 = jax.random.uniform(k_src, (1, C, H, W), dtype=jnp.float32)
    src_img = (src01 - 0.5) * 2.0

    params = {
        # synthetic LPIPS backbone conv (3x3, C->F) + nonneg 1x1 lin weights
        'w_lp':  jax.random.normal(k1, (K, F), dtype=jnp.float32) * 0.2,
        'b_lp':  jax.random.normal(k2, (1, F), dtype=jnp.float32) * 0.05,
        'w_lin': jnp.abs(jax.random.normal(k3, (F, 1), dtype=jnp.float32)) * 0.1,
        # synthetic classifier: conv (3x3, C->F2) + GAP + linear head (F2->NC)
        'w_clf': jax.random.normal(k4, (K, F2), dtype=jnp.float32) * 0.2,
        'b_clf': jax.random.normal(k5, (1, F2), dtype=jnp.float32) * 0.05,
        'w_head': jax.random.normal(k6, (F2, NC), dtype=jnp.float32) * 0.3,
        'b_head': jax.random.normal(k7, (1, NC), dtype=jnp.float32) * 0.05,
    }

    out = counterfactual_forward(x, src_img, params)
    out = jax.tree_util.tree_map(jax.block_until_ready, out)

    ref = reference_forward(x, src_img, params)
    assert out['lpips'].shape == (B, 1)
    assert out['predictions'].shape == (B, NC)
    assert jnp.allclose(out['lpips'], ref['lpips'], rtol=2e-2, atol=2e-2)
    assert jnp.allclose(out['predictions'], ref['predictions'], rtol=2e-2, atol=2e-2)

    # TODO(synk): torchvision.io.read_image / real LPIPS+classifier checkpoints
    # cannot be loaded here; networks are synthesized deterministically above.
    print("KERNEL_OK")
</pallas_src>

<mosaic_0001>
module attributes {stable_mosaic.version = 11 : i64} {
  func.func @cf_kernel(%arg0: i32, %arg1: i32, %arg2: memref<32x256xbf16, #tpu.memory_space<vmem>>, %arg3: memref<32x256xbf16, #tpu.memory_space<vmem>>, %arg4: memref<64x32xbf16, #tpu.memory_space<vmem>>, %arg5: memref<64x1xf32, #tpu.memory_space<vmem>>, %arg6: memref<32x32xbf16, #tpu.memory_space<vmem>>, %arg7: memref<32x1xf32, #tpu.memory_space<vmem>>, %arg8: memref<32x1xf32, #tpu.memory_space<vmem>>, %arg9: memref<2x32xf32, #tpu.memory_space<vmem>>, %arg10: memref<2x1xf32, #tpu.memory_space<vmem>>, %arg11: memref<8x128xf32, #tpu.memory_space<vmem>>, %arg12: memref<32x1xf32, #tpu.memory_space<vmem>>, %arg13: memref<32x1xf32, #tpu.memory_space<vmem>>) attributes {dimension_semantics = [#tpu.dimension_semantics<parallel>, #tpu.dimension_semantics<arbitrary>], iteration_bounds = array<i64: 2, 1>, scalar_prefetch = 0 : i64, scratch_operands = 2 : i64, tpu.core_type = #tpu.core_type<tc>, window_params = [{transform_indices = @transform_0, window_bounds = array<i64: 32, 256>}, {transform_indices = @transform_1, window_bounds = array<i64: 32, 256>}, {pipeline_mode = #tpu.pipeline_mode<synchronous>, transform_indices = @transform_2, window_bounds = array<i64: 64, 32>}, {pipeline_mode = #tpu.pipeline_mode<synchronous>, transform_indices = @transform_3, window_bounds = array<i64: 64, 1>}, {pipeline_mode = #tpu.pipeline_mode<synchronous>, transform_indices = @transform_4, window_bounds = array<i64: 32, 32>}, {pipeline_mode = #tpu.pipeline_mode<synchronous>, transform_indices = @transform_5, window_bounds = array<i64: 32, 1>}, {pipeline_mode = #tpu.pipeline_mode<synchronous>, transform_indices = @transform_6, window_bounds = array<i64: 32, 1>}, {pipeline_mode = #tpu.pipeline_mode<synchronous>, transform_indices = @transform_7, window_bounds = array<i64: 2, 32>}, {pipeline_mode = #tpu.pipeline_mode<synchronous>, transform_indices = @transform_8, window_bounds = array<i64: 2, 1>}, {transform_indices = @transform_9, window_bounds = array<i64: 8, 128>}]} {
    %c0_i32 = arith.constant 0 : i32
    %0 = arith.cmpi eq, %arg1, %c0_i32 : i32
    %1 = arith.extui %0 : i1 to i32
    %c0_i32_0 = arith.constant 0 : i32
    %2 = arith.cmpi ne, %1, %c0_i32_0 : i32
    scf.if %2 {
      %cst_32 = arith.constant 0.000000e+00 : f32
      %51 = vector.broadcast %cst_32 : f32 to vector<32x1xf32>
      %c0_33 = arith.constant 0 : index
      %c0_34 = arith.constant 0 : index
      %52 = vector.load %arg12[%c0_33, %c0_34] : memref<32x1xf32, #tpu.memory_space<vmem>>, vector<32x1xf32>
      tpu.vector_store %arg12[%c0_33, %c0_34], %51 {strides = array<i32>} : memref<32x1xf32, #tpu.memory_space<vmem>>, vector<32x1xf32>,
      %cst_35 = arith.constant 0.000000e+00 : f32
      %53 = vector.broadcast %cst_35 : f32 to vector<32x1xf32>
      %c0_36 = arith.constant 0 : index
      %c0_37 = arith.constant 0 : index
      %54 = vector.load %arg13[%c0_36, %c0_37] : memref<32x1xf32, #tpu.memory_space<vmem>>, vector<32x1xf32>
      tpu.vector_store %arg13[%c0_36, %c0_37], %53 {strides = array<i32>} : memref<32x1xf32, #tpu.memory_space<vmem>>, vector<32x1xf32>,
    } else {
    }
    %c0 = arith.constant 0 : index
    %c0_1 = arith.constant 0 : index
    %3 = vector.load %arg4[%c0, %c0_1] : memref<64x32xbf16, #tpu.memory_space<vmem>>, vector<64x32xbf16>
    %c0_2 = arith.constant 0 : index
    %c0_3 = arith.constant 0 : index
    %4 = vector.load %arg2[%c0_2, %c0_3] : memref<32x256xbf16, #tpu.memory_space<vmem>>, vector<32x256xbf16>
    %cst = arith.constant dense<0.000000e+00> : vector<64x256xf32>
    %5 = tpu.matmul %3, %4, %cst {dimension_numbers = #tpu.dot_dimension_numbers<[1], [0], [0], [1], [0, 0, 1, 1], [], []>} : vector<64x32xbf16>, vector<32x256xbf16>, vector<64x256xf32> -> vector<64x256xf32>
    %c0_4 = arith.constant 0 : index
    %c0_5 = arith.constant 0 : index
    %6 = vector.load %arg5[%c0_4, %c0_5] : memref<64x1xf32, #tpu.memory_space<vmem>>, vector<64x1xf32>
    %7 = vector.broadcast %6 : vector<64x1xf32> to vector<64x256xf32>
    %8 = arith.addf %5, %7 : vector<64x256xf32>
    %cst_6 = arith.constant 0.000000e+00 : f32
    %9 = vector.broadcast %cst_6 : f32 to vector<64x256xf32>
    %10 = arith.maximumf %8, %9 : vector<64x256xf32>
    %c0_7 = arith.constant 0 : index
    %c0_8 = arith.constant 0 : index
    %11 = vector.load %arg6[%c0_7, %c0_8] : memref<32x32xbf16, #tpu.memory_space<vmem>>, vector<32x32xbf16>
    %c0_9 = arith.constant 0 : index
    %c0_10 = arith.constant 0 : index
    %12 = vector.load %arg3[%c0_9, %c0_10] : memref<32x256xbf16, #tpu.memory_space<vmem>>, vector<32x256xbf16>
    %cst_11 = arith.constant dense<0.000000e+00> : vector<32x256xf32>
    %13 = tpu.matmul %11, %12, %cst_11 {dimension_numbers = #tpu.dot_dimension_numbers<[1], [0], [0], [1], [0, 0, 1, 1], [], []>} : vector<32x32xbf16>, vector<32x256xbf16>, vector<32x256xf32> -> vector<32x256xf32>
    %c0_12 = arith.constant 0 : index
    %c0_13 = arith.constant 0 : index
    %14 = vector.load %arg7[%c0_12, %c0_13] : memref<32x1xf32, #tpu.memory_space<vmem>>, vector<32x1xf32>
    %15 = vector.broadcast %14 : vector<32x1xf32> to vector<32x256xf32>
    %16 = arith.addf %13, %15 : vector<32x256xf32>
    %cst_14 = arith.constant 0.000000e+00 : f32
    %17 = vector.broadcast %cst_14 : f32 to vector<32x256xf32>
    %18 = arith.maximumf %16, %17 : vector<32x256xf32>
    %19 = vector.extract_strided_slice %10 {offsets = [0, 0], sizes = [32, 256], strides = [1, 1]} : vector<64x256xf32> to vector<32x256xf32>
    %20 = vector.extract_strided_slice %10 {offsets = [32, 0], sizes = [32, 256], strides = [1, 1]} : vector<64x256xf32> to vector<32x256xf32>
    %21 = arith.mulf %19, %19 : vector<32x256xf32>
    %cst_15 = arith.constant dense<0.000000e+00> : vector<256xf32>
    %22 = vector.multi_reduction <add>, %21, %cst_15 [0] : vector<32x256xf32> to vector<256xf32>
    %23 = vector.shape_cast %22 : vector<256xf32> to vector<1x256xf32>
    %cst_16 = arith.constant 1.000000e-10 : f32
    %24 = vector.broadcast %cst_16 : f32 to vector<1x256xf32>
    %25 = arith.addf %23, %24 : vector<1x256xf32>
    %26 = math.rsqrt %25 : vector<1x256xf32>
    %27 = vector.broadcast %26 : vector<1x256xf32> to vector<32x256xf32>
    %28 = arith.mulf %19, %27 : vector<32x256xf32>
    %29 = arith.mulf %18, %18 : vector<32x256xf32>
    %cst_17 = arith.constant dense<0.000000e+00> : vector<256xf32>
    %30 = vector.multi_reduction <add>, %29, %cst_17 [0] : vector<32x256xf32> to vector<256xf32>
    %31 = vector.shape_cast %30 : vector<256xf32> to vector<1x256xf32>
    %cst_18 = arith.constant 1.000000e-10 : f32
    %32 = vector.broadcast %cst_18 : f32 to vector<1x256xf32>
    %33 = arith.addf %31, %32 : vector<1x256xf32>
    %34 = math.rsqrt %33 : vector<1x256xf32>
    %35 = vector.broadcast %34 : vector<1x256xf32> to vector<32x256xf32>
    %36 = arith.mulf %18, %35 : vector<32x256xf32>
    %37 = arith.subf %28, %36 : vector<32x256xf32>
    %38 = arith.mulf %37, %37 : vector<32x256xf32>
    %cst_19 = arith.constant 1.000000e+00 : f32
    %39 = vector.broadcast %cst_19 : f32 to vector<256x1xf32>
    %c0_20 = arith.constant 0 : index
    %c0_21 = arith.constant 0 : index
    %40 = vector.load %arg12[%c0_20, %c0_21] : memref<32x1xf32, #tpu.memory_space<vmem>>, vector<32x1xf32>
    %cst_22 = arith.constant dense<0.000000e+00> : vector<32x1xf32>
    %41 = tpu.matmul %38, %39, %cst_22 {dimension_numbers = #tpu.dot_dimension_numbers<[1], [0], [0], [1], [0, 0, 1, 1], [], []>} : vector<32x256xf32>, vector<256x1xf32>, vector<32x1xf32> -> vector<32x1xf32>
    %42 = arith.addf %40, %41 : vector<32x1xf32>
    %c0_23 = arith.constant 0 : index
    %c0_24 = arith.constant 0 : index
    %43 = vector.load %arg12[%c0_23, %c0_24] : memref<32x1xf32, #tpu.memory_space<vmem>>, vector<32x1xf32>
    tpu.vector_store %arg12[%c0_23, %c0_24], %42 {strides = array<i32>} : memref<32x1xf32, #tpu.memory_space<vmem>>, vector<32x1xf32>,
    %c0_25 = arith.constant 0 : index
    %c0_26 = arith.constant 0 : index
    %44 = vector.load %arg13[%c0_25, %c0_26] : memref<32x1xf32, #tpu.memory_space<vmem>>, vector<32x1xf32>
    %cst_27 = arith.constant dense<0.000000e+00> : vector<32x1xf32>
    %45 = tpu.matmul %20, %39, %cst_27 {dimension_numbers = #tpu.dot_dimension_numbers<[1], [0], [0], [1], [0, 0, 1, 1], [], []>} : vector<32x256xf32>, vector<256x1xf32>, vector<32x1xf32> -> vector<32x1xf32>
    %46 = arith.addf %44, %45 : vector<32x1xf32>
    %c0_28 = arith.constant 0 : index
    %c0_29 = arith.constant 0 : index
    %47 = vector.load %arg13[%c0_28, %c0_29] : memref<32x1xf32, #tpu.memory_space<vmem>>, vector<32x1xf32>
    tpu.vector_store %arg13[%c0_28, %c0_29], %46 {strides = array<i32>} : memref<32x1xf32, #tpu.memory_space<vmem>>, vector<32x1xf32>,
    %c0_i32_30 = arith.constant 0 : i32
    %48 = arith.cmpi eq, %arg1, %c0_i32_30 : i32
    %49 = arith.extui %48 : i1 to i32
    %c0_i32_31 = arith.constant 0 : i32
    %50 = arith.cmpi ne, %49, %c0_i32_31 : i32
    scf.if %50 {
      %c0_32 = arith.constant 0 : index
      %c0_33 = arith.constant 0 : index
      %51 = vector.load %arg8[%c0_32, %c0_33] : memref<32x1xf32, #tpu.memory_space<vmem>>, vector<32x1xf32>
      %c0_34 = arith.constant 0 : index
      %c0_35 = arith.constant 0 : index
      %52 = vector.load %arg12[%c0_34, %c0_35] : memref<32x1xf32, #tpu.memory_space<vmem>>, vector<32x1xf32>
      %53 = arith.mulf %51, %52 : vector<32x1xf32>
      %cst_36 = arith.constant dense<0.000000e+00> : vector<1xf32>
      %54 = vector.multi_reduction <add>, %53, %cst_36 [0] : vector<32x1xf32> to vector<1xf32>
      %55 = vector.shape_cast %54 : vector<1xf32> to vector<1x1xf32>
      %cst_37 = arith.constant 3.906250e-03 : f32
      %56 = vector.broadcast %cst_37 : f32 to vector<1x1xf32>
      %57 = arith.mulf %55, %56 : vector<1x1xf32>
      %c0_38 = arith.constant 0 : index
      %c0_39 = arith.constant 0 : index
      %58 = vector.load %arg9[%c0_38, %c0_39] : memref<2x32xf32, #tpu.memory_space<vmem>>, vector<2x32xf32>
      %c0_40 = arith.constant 0 : index
      %c0_41 = arith.constant 0 : index
      %59 = vector.load %arg13[%c0_40, %c0_41] : memref<32x1xf32, #tpu.memory_space<vmem>>, vector<32x1xf32>
      %cst_42 = arith.constant 3.906250e-03 : f32
      %60 = vector.broadcast %cst_42 : f32 to vector<32x1xf32>
      %61 = arith.mulf %59, %60 : vector<32x1xf32>
      %cst_43 = arith.constant dense<0.000000e+00> : vector<2x1xf32>
      %62 = tpu.matmul %58, %61, %cst_43 {dimension_numbers = #tpu.dot_dimension_numbers<[1], [0], [0], [1], [0, 0, 1, 1], [], []>} : vector<2x32xf32>, vector<32x1xf32>, vector<2x1xf32> -> vector<2x1xf32>
      %c0_44 = arith.constant 0 : index
      %c0_45 = arith.constant 0 : index
      %63 = vector.load %arg10[%c0_44, %c0_45] : memref<2x1xf32, #tpu.memory_space<vmem>>, vector<2x1xf32>
      %64 = arith.addf %62, %63 : vector<2x1xf32>
      %cst_46 = arith.constant 0.000000e+00 : f32
      %65 = vector.broadcast %cst_46 : f32 to vector<5x1xf32>
      %66 = tpu.concatenate %57, %64, %65 in 0 : vector<1x1xf32>, vector<2x1xf32>, vector<5x1xf32> -> vector<8x1xf32>
      %67 = tpu.iota {dimensions = array<i32: 1>} : vector<8x128xi32>
      %c0_i32_47 = arith.constant 0 : i32
      %68 = vector.broadcast %c0_i32_47 : i32 to vector<8x128xi32>
      %69 = arith.cmpi eq, %67, %68 : vector<8x128xi32>
      %cst_48 = arith.constant 0.000000e+00 : f32
      %70 = vector.shape_cast %66 : vector<8x1xf32> to vector<8x1xf32>
      %71 = vector.broadcast %70 : vector<8x1xf32> to vector<8x128xf32>
      %72 = vector.broadcast %cst_48 : f32 to vector<8x128xf32>
      %73 = arith.select %69, %71, %72 : vector<8x128xi1>, vector<8x128xf32>
      %c0_49 = arith.constant 0 : index
      %c0_50 = arith.constant 0 : index
      %74 = vector.load %arg11[%c0_49, %c0_50] : memref<8x128xf32, #tpu.memory_space<vmem>>, vector<8x128xf32>
      tpu.vector_store %arg11[%c0_49, %c0_50], %73 {strides = array<i32>} : memref<8x128xf32, #tpu.memory_space<vmem>>, vector<8x128xf32>,
    } else {
    }
    return
  }
  func.func @transform_0(%arg0: i32, %arg1: i32) -> (i32, i32) {
    %c1_i32 = arith.constant 1 : i32
    %0 = arith.muli %arg0, %c1_i32 : i32
    %1 = arith.addi %0, %arg1 : i32
    %c0_i32 = arith.constant 0 : i32
    %c0_i32_0 = arith.constant 0 : i32
    return %c0_i32, %1 : i32, i32
  }
  func.func @transform_1(%arg0: i32, %arg1: i32) -> (i32, i32) {
    %c0_i32 = arith.constant 0 : i32
    %c0_i32_0 = arith.constant 0 : i32
    return %c0_i32, %arg1 : i32, i32
  }
  func.func @transform_2(%arg0: i32, %arg1: i32) -> (i32, i32) {
    %c0_i32 = arith.constant 0 : i32
    %c0_i32_0 = arith.constant 0 : i32
    %c0_i32_1 = arith.constant 0 : i32
    return %c0_i32, %c0_i32_0 : i32, i32
  }
  func.func @transform_3(%arg0: i32, %arg1: i32) -> (i32, i32) {
    %c0_i32 = arith.constant 0 : i32
    %c0_i32_0 = arith.constant 0 : i32
    %c0_i32_1 = arith.constant 0 : i32
    return %c0_i32, %c0_i32_0 : i32, i32
  }
  func.func @transform_4(%arg0: i32, %arg1: i32) -> (i32, i32) {
    %c0_i32 = arith.constant 0 : i32
    %c0_i32_0 = arith.constant 0 : i32
    %c0_i32_1 = arith.constant 0 : i32
    return %c0_i32, %c0_i32_0 : i32, i32
  }
  func.func @transform_5(%arg0: i32, %arg1: i32) -> (i32, i32) {
    %c0_i32 = arith.constant 0 : i32
    %c0_i32_0 = arith.constant 0 : i32
    %c0_i32_1 = arith.constant 0 : i32
    return %c0_i32, %c0_i32_0 : i32, i32
  }
  func.func @transform_6(%arg0: i32, %arg1: i32) -> (i32, i32) {
    %c0_i32 = arith.constant 0 : i32
    %c0_i32_0 = arith.constant 0 : i32
    %c0_i32_1 = arith.constant 0 : i32
    return %c0_i32, %c0_i32_0 : i32, i32
  }
  func.func @transform_7(%arg0: i32, %arg1: i32) -> (i32, i32) {
    %c0_i32 = arith.constant 0 : i32
    %c0_i32_0 = arith.constant 0 : i32
    %c0_i32_1 = arith.constant 0 : i32
    return %c0_i32, %c0_i32_0 : i32, i32
  }
  func.func @transform_8(%arg0: i32, %arg1: i32) -> (i32, i32) {
    %c0_i32 = arith.constant 0 : i32
    %c0_i32_0 = arith.constant 0 : i32
    %c0_i32_1 = arith.constant 0 : i32
    return %c0_i32, %c0_i32_0 : i32, i32
  }
  func.func @transform_9(%arg0: i32, %arg1: i32) -> (i32, i32) {
    %c0_i32 = arith.constant 0 : i32
    %c0_i32_0 = arith.constant 0 : i32
    return %arg0, %c0_i32 : i32, i32
  }
}

</mosaic_0001>

<bundles_post_ra>
// kernel: counterfactual_forward.1
= control target key start
LH: loop header
LB: loop body
LE: loop exit
PB: predicated region body
PF: predicated region fallthrough
CT: control target
= control target key end

     0   :  { %s1568_s30 = smov 0   ;;  %s1570_s10 = smov 0   ;;  %s1913_s0 = inlined_call_operand.vmem [shape: bf16[32,512], index: 0, kind: input, shape index: {}]   ;;  %s1914_s1 = inlined_call_operand.vmem [shape: bf16[32,256], index: 1, kind: input, shape index: {}]   ;;  %s1915_s2 = inlined_call_operand.vmem [shape: bf16[64,32], index: 2, kind: input, shape index: {}]   ;;  %s1916_s3 = inlined_call_operand.vmem [shape: f32[64,1], index: 3, kind: input, shape index: {}]   ;;  %s1917_s4 = inlined_call_operand.vmem [shape: bf16[32,32], index: 4, kind: input, shape index: {}]   ;;  %s1918_s5 = inlined_call_operand.vmem [shape: f32[32,1], index: 5, kind: input, shape index: {}]   ;;  %s1919_s6 = inlined_call_operand.vmem [shape: f32[32,1], index: 6, kind: input, shape index: {}]   ;;  %s1920_s7 = inlined_call_operand.vmem [shape: f32[2,32], index: 7, kind: input, shape index: {}]   ;;  %s1921_s8 = inlined_call_operand.vmem [shape: f32[2,1], index: 8, kind: input, shape index: {}]   ;;  %s1922_s9 = inlined_call_operand.vmem [shape: f32[16,128], index: 9, kind: output, shape index: {}]  }
   0x1   :  { %s1572_s11 = smov 0   ;;  %s1574_s12 = smov 0  }
   0x2   :  { %s1576_s13 = smov 0  }
   0x3 LB: > { %s31_s14 = sadd.s32 1, %s1508_s12  ;;  %p47_p1 = scmp.ne.s32.totalorder %s1500_s10, %s1496_s30  ;;  %s1512_s13 = sphi %s1576_s13, %s19_s13   ;;  %s1508_s12 = sphi %s1574_s12, %s1926_s12   ;;  %s1504_s11 = sphi %s1572_s11, %s1925_s11   ;;  %s1500_s10 = sphi %s1570_s10, %s1924_s10   ;;  %s1496_s30 = sphi %s1568_s30, %s1923_s30  }
   0x4   : > { %p33_p0 = scmp.ge.s32.totalorder %s31_s14, 2  ;;  %p48_p2 = scmp.eq.s32.totalorder %s1512_s13, 0 }
   0x5   : > { %s40_s16 = sadd.s32 1, %s1500_s10  ;;  %p1267_p5 = scmp.ge.s32.totalorder %s1512_s13, 2 }
   0x6   : > { %s1928_s14 = smov (%p33_p0, %s31_s14), 0  ;;  %p49_p3 = por %p48_p2, %p47_p1 }
   0x7   : > { %s37_s15 = ssub.s32 %s1508_s12, %s1928_s14  ;;  %302 = sbr.rel (%p1267_p5) target bundleno = 18 (0x12), region = 48 }
   0x8   : > { %p38_p4 = scmp.eq.s32.totalorder %s37_s15, 0 }
   0xa   : > { %s1603_s17 = scalar_select %p38_p4, %s1500_s10, %s40_s16  }
   0xc   : > { %305 = sbr.rel (!%p49_p3) target bundleno = 18 (0x12), region = 52  ;;  %s307_s18 = sand.u32 (%p49_p3), 1, %s1500_s10  }
   0xd   : > { %s1297_s19 = sshll.u32 (%p49_p3), %s1508_s12, 3  ;;  %s1268_s20 = sshll.u32 (%p49_p3), %s307_s18, 5 }
   0xe   : > { %s313_s23 = scalar_lea.vmem (%p49_p3), %s1913_s0, %s1297_s19  ;;  %s309_s24 = scalar_lea.vmem (%p49_p3), [#allocation4], %s1268_s20 }
   0xf   : > { %v348_v0 = vld [vmem:[%s313_s23] sm:$0xff] (%p49_p3)  ;;  %v350_v1 = vld [vmem:[%s313_s23 + $0x10] sm:$0xff] (%p49_p3) }
  0x10   : > { %v352_v2 = vld [vmem:[%s313_s23 + $0x20] sm:$0xff] (%p49_p3)  ;;  %349 = vst [vmem:[%s309_s24] sm:$0xff] (%p49_p3), %v348_v0  ;;  %351 = vst [vmem:[%s309_s24 + $0x8] sm:$0xff] (%p49_p3), %v350_v1  ;;  %v354_v3 = vld [vmem:[%s313_s23 + $0x30] sm:$0xff] (%p49_p3) }
  0x11   : > { %353 = vst [vmem:[%s309_s24 + $0x10] sm:$0xff] %v352_v2  ;;  %355 = vst [vmem:[%s309_s24 + $0x18] sm:$0xff] %v354_v3 }
  0x12 PF: > { %p1271_p6 = scmp.ge.s32.totalorder %s1512_s13, 1  ;;  %p360_p7 = scmp.lt.s32.totalorder %s1512_s13, 3 }
  0x14   : > { %p361_p8 = pnand %p1271_p6, %p360_p7 }
  0x15   : > { %s367_s27 = sand.u32 (!%p361_p8), 1, %s1496_s30   ;;  %p414_p9 = scmp.lt.s32.totalorder (!%p361_p8), %s1504_s11, 1 }
  0x16   : > { %364 = sbr.rel (%p361_p8) target bundleno = 808 (0x328), region = 90  ;;  %s1272_s15 = sshll.u32 (!%p361_p8), %s367_s27, 5 }
  0x17   : > { %s369_s30 = scalar_lea.vmem (!%p361_p8), [#allocation4], %s1272_s15 }
  0x1b   : > { %v1448_v4 = vld [vmem:[%s1914_s1 + $0x14] ss:$8 sps:$4 sm:$0xff]   ;;  %v1450_v5 = vld [vmem:[%s1914_s1 + $0x10] ss:$8 sps:$4 sm:$0xff]   ;;  %v1514_v6 = vmov 0   ;;  %v1460_v11 = vld [vmem:[%s1917_s4] sm:$0xff]  }
  0x1c   : > { %734 = vmatprep.mubr.bf16.mxu1 %v1514_v6  ;;  %577 = vmatprep.mubr.bf16.mxu0 %v1514_v6  ;;  %v1454_v7 = vld [vmem:[%s1914_s1 + $0x4] ss:$8 sps:$4 sm:$0xff]   ;;  %v1456_v8 = vld [vmem:[%s1914_s1] ss:$8 sps:$4 sm:$0xff]   ;;  %v1451_v9 = vld [vmem:[%s369_s30 + $0x14] ss:$8 sps:$4 sm:$0xff]  }
  0x1d   : > { %714 = vmatprep.subr.bf16.mxu1 %v1448_v4  ;;  %1447 = vset.pattern.permute.xlu1 %v1514_v6  ;;  %v1453_v10 = vld [vmem:[%s369_s30 + $0x10] ss:$8 sps:$4 sm:$0xff]   ;;  %v1457_v12 = vld [vmem:[%s369_s30 + $0x4] ss:$8 sps:$4 sm:$0xff]   ;;  %v1459_v13 = vld [vmem:[%s369_s30] ss:$8 sps:$4 sm:$0xff]  }
  0x1e   : > { %715 = vmatpush1.bf16.msra.mxu1 %v1450_v5  ;;  %1446 = vset.pattern.permute.xlu0 %v1514_v6  ;;  %vm532_vm0 = vcmask 261120   ;;  %v1515_v14 = vmov 1.0   ;;  %v1461_v15 = vld [vmem:[%s1915_s2] sm:$0xff]   ;;  %v450_v16 = vld [vmem:[%s1916_s3 + $0x30] sm:$0xff]  ;;  %v451_v18 = vld [vmem:[%s1916_s3 + $0x38] sm:$0xff]  ;;  %vm423_vm1 = vcmask 7168  }
  0x1f   : > { %716 = vmatprep.subr.bf16.mxu1 %v1454_v7  ;;  %557 = vmatprep.subr.bf16.mxu0 %v1451_v9  ;;  %v448_v17 = vld [vmem:[%s1916_s3 + $0x20] sm:$0xff]  ;;  %v449_v19 = vld [vmem:[%s1916_s3 + $0x28] sm:$0xff]  ;;  %v1464_v26 = vld [vmem:[%s1915_s2 + $0x10] sm:$0xff]   ;;  %vm1517_vm2 = vmmov 0   ;;  %vm1165_vm3 = vcmask 1040384   ;;  %vm1167_vm4 = vcmask 1042432  }
  0x20   : > { %558 = vmatpush1.bf16.msra.mxu0 %v1453_v10  ;;  %484 = vperm.xlu1 %1447, %v450_v16   ;;  %v1462_v20 = vld [vmem:[%s1917_s4 + $0x8] sm:$0xff]   ;;  %v444_v23 = vld [vmem:[%s1916_s3] sm:$0xff]  ;;  %v644_v27 = vld [vmem:[%s1918_s5 + $0x10] sm:$0xff]  ;;  %s1930_s11 = smov (!%p414_p9, %s1504_s11), 1 }
  0x21   : > { %559 = vmatprep.subr.bf16.mxu0 %v1457_v12  ;;  %474 = vperm.xlu0 %1446, %v448_v17   ;;  %v1463_v21 = vld [vmem:[%s1915_s2 + $0x8] sm:$0xff]   ;;  %v642_v25 = vld [vmem:[%s1918_s5] sm:$0xff]  ;;  %v446_v28 = vld [vmem:[%s1916_s3 + $0x10] sm:$0xff]  ;;  %s1273_s24 = sshll.u32 %s1930_s11, 3 }
  0x22   : > { %717 = vmatpush1.bf16.msra.mxu1 %v1456_v8  ;;  %v445_v22 = vld [vmem:[%s1916_s3 + $0x8] sm:$0xff]  ;;  %v645_v29 = vld [vmem:[%s1918_s5 + $0x18] sm:$0xff]  ;;  %s417_s27 = scalar_lea.vmem %s1922_s9, %s1273_s24 }
  0x23   : > { %1342 = vmatprep.subr.mxu1 %v1515_v14  ;;  %v643_v24 = vld [vmem:[%s1918_s5 + $0x8] sm:$0xff]  ;;  %v447_v30 = vld [vmem:[%s1916_s3 + $0x18] sm:$0xff] }
  0x24   : > { %560 = vmatpush1.bf16.msra.mxu0 %v1459_v13  ;;  %489 = vperm.xlu1 %1447, %v451_v18   ;;  %v1465_v31 = vld [vmem:[%s1915_s2 + $0x18] sm:$0xff]  }
  0x25   : > { %1292 = vmatmul.mubr.msk.bf16.vlgmr.msra.gmra.mxu1 %vm532_vm0, %v1460_v11  ;;  %1298 = vmatprep.subr.mxu0 %v1515_v14 }
  0x26   : > { %744 = vmatprep.mubr.bf16.mxu1 %v1514_v6  ;;  %1343 = vmatpush3.msra.mxu1 %v1515_v14 }
  0x27   : > { %1282 = vmatmul.mubr.msk.bf16.vlgmr.msra.gmra.mxu0 %vm532_vm0, %v1461_v15  ;;  %1344 = vmatprep.subr.mxu1 %v1515_v14 }
  0x28   : > { %587 = vmatprep.mubr.bf16.mxu0 %v1514_v6  ;;  %1345 = vmatpush3.msra.mxu1 %v1515_v14 }
  0x29   : > { %1346 = vmatprep.subr.mxu1 %v1515_v14  ;;  %479 = vperm.xlu0 %1446, %v449_v19  }
  0x2a   : > { %1347 = vmatpush3.msra.mxu1 %v1515_v14  ;;  %1299 = vmatpush3.msra.mxu0 %v1515_v14 }
  0x2b   : > { %1348 = vmatprep.subr.mxu1 %v1515_v14  ;;  %1300 = vmatprep.subr.mxu0 %v1515_v14 }
  0x2c   : > { %1349 = vmatpush3.msra.mxu1 %v1515_v14  ;;  %459 = vperm.xlu1 %1447, %v445_v22  }
  0x2d   : > { %1293 = vmatmul.mubr.msk.bf16.gmra.mxu1 %vm532_vm0, %v1462_v20  ;;  %454 = vperm.xlu0 %1446, %v444_v23  }
  0x2e   : > { %1350 = vmatprep.subr.mxu1 %v1515_v14  ;;  %1301 = vmatpush3.msra.mxu0 %v1515_v14 }
  0x2f   : > { %1283 = vmatmul.mubr.msk.bf16.gmra.mxu0 %vm532_vm0, %v1463_v21  ;;  %1351 = vmatpush3.msra.mxu1 %v1515_v14 }
  0x30   : > { %597 = vmatprep.mubr.bf16.mxu0 %v1514_v6  ;;  %1352 = vmatprep.subr.mxu1 %v1515_v14 }
  0x31   : > { %653 = vperm.xlu1 %1447, %v643_v24   ;;  %648 = vperm.xlu0 %1446, %v642_v25  }
  0x32   : > { %1353 = vmatpush3.msra.mxu1 %v1515_v14  ;;  %1302 = vmatprep.subr.mxu0 %v1515_v14 }
  0x33   : > { %1354 = vmatprep.subr.mxu1 %v1515_v14  ;;  %1303 = vmatpush3.msra.mxu0 %v1515_v14 }
  0x34   : > { %1355 = vmatpush3.msra.mxu1 %v1515_v14  ;;  %1304 = vmatprep.subr.mxu0 %v1515_v14 }
  0x35   : > { %658 = vperm.xlu1 %1447, %v644_v27   ;;  %464 = vperm.xlu0 %1446, %v446_v28  }
  0x36   : > { %1356 = vmatprep.subr.mxu1 %v1515_v14  ;;  %1305 = vmatpush3.msra.mxu0 %v1515_v14 }
  0x37   : > { %1284 = vmatmul.mubr.msk.bf16.gmra.mxu0 %vm532_vm0, %v1464_v26  ;;  %1357 = vmatpush3.msra.mxu1 %v1515_v14 }
  0x38   : > { %607 = vmatprep.mubr.bf16.mxu0 %v1514_v6  ;;  %1358 = vmatprep.subr.mxu1 %v1515_v14 }
  0x39   : > { %663 = vperm.xlu1 %1447, %v645_v29   ;;  %469 = vperm.xlu0 %1446, %v447_v30  }
  0x3a   : > { %1359 = vmatpush3.msra.mxu1 %v1515_v14  ;;  %1306 = vmatprep.subr.mxu0 %v1515_v14 }
  0x3b   : > { %1360 = vmatprep.subr.mxu1 %v1515_v14  ;;  %1307 = vmatpush3.msra.mxu0 %v1515_v14 }
  0x3c   : > { %1361 = vmatpush3.msra.mxu1 %v1515_v14  ;;  %1308 = vmatprep.subr.mxu0 %v1515_v14 }
  0x3d   : > { %1362 = vmatprep.subr.mxu1 %v1515_v14  ;;  %1309 = vmatpush3.msra.mxu0 %v1515_v14 }
  0x3e   : > { %1363 = vmatpush3.msra.mxu1 %v1515_v14  ;;  %1310 = vmatprep.subr.mxu0 %v1515_v14 }
  0x3f   : > { %1285 = vmatmul.mubr.msk.bf16.gmra.mxu0 %vm532_vm0, %v1465_v31  ;;  %1364 = vmatprep.subr.mxu1 %v1515_v14 }
  0x40   : > { %1365 = vmatpush3.msra.mxu1 %v1515_v14  ;;  %1311 = vmatpush3.msra.mxu0 %v1515_v14 }
  0x41   : > { %1366 = vmatprep.subr.mxu1 %v1515_v14  ;;  %1312 = vmatprep.subr.mxu0 %v1515_v14 }
  0x42   : > { %1367 = vmatpush3.msra.mxu1 %v1515_v14  ;;  %1313 = vmatpush3.msra.mxu0 %v1515_v14 }
  0x43   : > { %1368 = vmatprep.subr.mxu1 %v1515_v14  ;;  %1314 = vmatprep.subr.mxu0 %v1515_v14 }
  0x44   : > { %1369 = vmatpush3.msra.mxu1 %v1515_v14  ;;  %1315 = vmatpush3.msra.mxu0 %v1515_v14 }
  0x45   : > { %1370 = vmatprep.subr.mxu1 %v1515_v14  ;;  %1316 = vmatprep.subr.mxu0 %v1515_v14 }
  0x46   : > { %1371 = vmatpush3.msra.mxu1 %v1515_v14  ;;  %1317 = vmatpush3.msra.mxu0 %v1515_v14 }
  0x47   : > { %1372 = vmatprep.subr.mxu1 %v1515_v14  ;;  %1318 = vmatprep.subr.mxu0 %v1515_v14 }
  0x48   : > { %1373 = vmatpush3.msra.mxu1 %v1515_v14  ;;  %1319 = vmatpush3.msra.mxu0 %v1515_v14 }
  0x49   : > { %1320 = vmatprep.subr.mxu0 %v1515_v14 }
  0x4a   : > { %1321 = vmatpush3.msra.mxu0 %v1515_v14 }
  0x4b   : > { %1322 = vmatprep.subr.mxu0 %v1515_v14 }
  0x4c   : > { %1323 = vmatpush3.msra.mxu0 %v1515_v14 }
  0x4d   : > { %1324 = vmatprep.subr.mxu0 %v1515_v14 }
  0x4e   : > { %1325 = vmatpush3.msra.mxu0 %v1515_v14 }
  0x4f   : > { %1326 = vmatprep.subr.mxu0 %v1515_v14 }
  0x50   : > { %1327 = vmatpush3.msra.mxu0 %v1515_v14 }
  0x51   : > { %1328 = vmatprep.subr.mxu0 %v1515_v14 }
  0x52   : > { %1329 = vmatpush3.msra.mxu0 %v1515_v14 }
  0x9b   : > { %v1758_v32 = vpop.permute.xlu1 %484 }
  0x9c   : > { %v1760_v33 = vpop.permute.xlu0 %474 }
  0x9f   : > { %v1762_v34 = vpop.permute.xlu1 %489 }
  0xa4   : > { %v1764_v35 = vpop.permute.xlu0 %479 }
  0xa7   : > { %v460_v36 = vpop.permute.xlu1 %459 }
  0xa8   : > { %v455_v37 = vpop.permute.xlu0 %454 }
  0xac   : > { %v654_v38 = vpop.permute.xlu1 %653  ;;  %v649_v39 = vpop.permute.xlu0 %648 }
  0xb0   : > { %v659_v47 = vpop.permute.xlu1 %658  ;;  %v465_v57 = vpop.permute.xlu0 %464 }
  0xb4   : > { %v664_v6 = vpop.permute.xlu1 %663  ;;  %v470_v21 = vpop.permute.xlu0 %469 }
  0xe5   : > { %v736_v40 = vpop.f32.mrf.mxu1 }
  0xe6   : > { %v737_v41 = vadd.f32 %v736_v40, %v649_v39 }
  0xe7   : > { %v738_v42 = vpop.f32.mrf.mxu1  ;;  %v579_v43 = vpop.f32.mrf.mxu0 }
  0xe8   : > { %v739_v44 = vadd.f32 %v738_v42, %v649_v39  ;;  %v1766_v45 = vmax.f32 %v737_v41, 0.0  ;;  %v580_v51 = vadd.f32 %v579_v43, %v455_v37 }
  0xe9   : > { %v740_v46 = vpop.f32.mrf.mxu1  ;;  %v581_v49 = vpop.f32.mrf.mxu0 }
  0xea   : > { %v741_v48 = vadd.f32 %v740_v46, %v654_v38  ;;  %v1768_v50 = vmax.f32 %v739_v44, 0.0  ;;  %v801_v55 = vmul.f32 %v1766_v45, %v1766_v45  ;;  %v582_v58 = vadd.f32 %v581_v49, %v455_v37 }
  0xeb   : > { %v742_v52 = vpop.f32.mrf.mxu1  ;;  %v583_v56 = vpop.f32.mrf.mxu0  ;;  %v1780_v2 = vmax.f32 %v580_v51, 0.0 }
  0xec   : > { %v1770_v53 = vmax.f32 %v741_v48, 0.0  ;;  %v743_v54 = vadd.f32 %v742_v52, %v654_v38  ;;  %v584_v59 = vadd.f32 %v583_v56, %v460_v36  ;;  %v802_v63 = vmul.f32 %v1768_v50, %v1768_v50 }
  0xed   : > { %v746_v60 = vpop.f32.mrf.mxu1  ;;  %v585_v1 = vpop.f32.mrf.mxu0  ;;  %v1788_v12 = vmax.f32 %v582_v58, 0.0  ;;  %v763_v22 = vmul.f32 %v1780_v2, %v1780_v2 }
  0xee   : > { %v803_v61 = vmul.f32 %v1770_v53, %v1770_v53  ;;  %v1776_v62 = vmax.f32 %v743_v54, 0.0  ;;  %v747_v0 = vadd.f32 %v746_v60, %v659_v47  ;;  %v1782_v3 = vmax.f32 %v584_v59, 0.0 }
  0xef   : > { %v586_v4 = vadd.f32 %v585_v1, %v460_v36  ;;  %v748_v5 = vpop.f32.mrf.mxu1  ;;  %v589_v11 = vpop.f32.mrf.mxu0  ;;  %v764_v40 = vmul.f32 %v1788_v12, %v1788_v12 }
  0xf0   : > { %v804_v7 = vmul.f32 %v1776_v62, %v1776_v62  ;;  %v809_v8 = vadd.f32 %v803_v61, %v801_v55  ;;  %v1786_v9 = vmax.f32 %v747_v0, 0.0  ;;  %v749_v10 = vadd.f32 %v748_v5, %v659_v47 }
  0xf1   : > { %v1790_v13 = vmax.f32 %v586_v4, 0.0  ;;  %v590_v14 = vadd.f32 %v589_v11, %v465_v57  ;;  %v750_v15 = vpop.f32.mrf.mxu1  ;;  %v591_v20 = vpop.f32.mrf.mxu0  ;;  %v765_v23 = vmul.f32 %v1782_v3, %v1782_v3 }
  0xf2   : > { %v818_v16 = vadd.f32 %v804_v7, %v802_v63  ;;  %v805_v17 = vmul.f32 %v1786_v9, %v1786_v9  ;;  %v1794_v18 = vmax.f32 %v749_v10, 0.0  ;;  %v751_v19 = vadd.f32 %v750_v15, %v664_v6 }
  0xf3   : > { %v1800_v24 = vmax.f32 %v590_v14, 0.0  ;;  %v592_v25 = vadd.f32 %v591_v20, %v465_v57  ;;  %v752_v26 = vpop.f32.mrf.mxu1  ;;  %v593_v31 = vpop.f32.mrf.mxu0  ;;  %v766_v36 = vmul.f32 %v1790_v13, %v1790_v13  ;;  %v771_v46 = vadd.f32 %v765_v23, %v763_v22 }
  0xf4   : > { %v810_v27 = vadd.f32 %v809_v8, %v805_v17  ;;  %v806_v28 = vmul.f32 %v1794_v18, %v1794_v18  ;;  %v1804_v29 = vmax.f32 %v751_v19, 0.0  ;;  %v753_v30 = vadd.f32 %v752_v26, %v664_v6 }
  0xf5   : > { %v767_v37 = vmul.f32 %v1800_v24, %v1800_v24  ;;  %v1810_v38 = vmax.f32 %v592_v25, 0.0  ;;  %v594_v39 = vadd.f32 %v593_v31, %v470_v21  ;;  %v595_v44 = vpop.f32.mrf.mxu0  ;;  %v780_v55 = vadd.f32 %v766_v36, %v764_v40 }
  0xf6   : > { %v819_v41 = vadd.f32 %v818_v16, %v806_v28  ;;  %v807_v42 = vmul.f32 %v1804_v29, %v1804_v29  ;;  %v1816_v43 = vmax.f32 %v753_v30, 0.0  ;;  %v596_v49 = vadd.f32 %v595_v44, %v470_v21 }
  0xf7   : > { %v768_v47 = vmul.f32 %v1810_v38, %v1810_v38  ;;  %v1820_v48 = vmax.f32 %v594_v39, 0.0  ;;  %v599_v54 = vpop.f32.mrf.mxu0  ;;  %v772_v56 = vadd.f32 %v771_v46, %v767_v37 }
  0xf8   : > { %v811_v51 = vadd.f32 %v810_v27, %v807_v42  ;;  %v808_v52 = vmul.f32 %v1816_v43, %v1816_v43  ;;  %v1826_v58 = vmax.f32 %v596_v49, 0.0  ;;  %v600_v61 = vadd.f32 %v599_v54, %v1760_v33 }
  0xf9   : > { %v769_v57 = vmul.f32 %v1820_v48, %v1820_v48  ;;  %v601_v63 = vpop.f32.mrf.mxu0  ;;  %v781_v0 = vadd.f32 %v780_v55, %v768_v47 }
  0xfa   : > { %v812_v59 = vrot.slane %v811_v51, 4  ;;  %v820_v60 = vadd.f32 %v819_v41, %v808_v52  ;;  %v770_v4 = vmul.f32 %v1826_v58, %v1826_v58  ;;  %v602_v5 = vadd.f32 %v601_v63, %v1760_v33 }
  0xfb   : > { %v773_v1 = vadd.f32 %v772_v56, %v769_v57  ;;  %v603_v8 = vpop.f32.mrf.mxu0  ;;  %v626_v17 = vmax.f32 %v600_v61, 0.0 }
  0xfc   : > { %v813_v6 = vadd.f32 %v812_v59, %v811_v51  ;;  %v821_v7 = vrot.slane %v820_v60, 4  ;;  %v782_v11 = vadd.f32 %v781_v0, %v770_v4  ;;  %v627_v14 = vmax.f32 %v602_v5, 0.0 }
  0xfd   : > { %v774_v10 = vrot.slane %v773_v1, 4  ;;  %v604_v19 = vadd.f32 %v603_v8, %v1764_v35  ;;  %v605_v20 = vpop.f32.mrf.mxu0 }
  0xfe   : > { %v814_v15 = vrot.slane %v813_v6, 2  ;;  %v822_v16 = vadd.f32 %v821_v7, %v820_v60  ;;  %v783_v22 = vrot.slane %v782_v11, 4  ;;  %v606_v23 = vadd.f32 %v605_v20, %v1764_v35  ;;  %1021 = vmatprep.mubr.f32.mxu1 %v627_v14 }
  0xff   : > { %v775_v21 = vadd.f32 %v774_v10, %v773_v1  ;;  %v609_v33 = vpop.f32.mrf.mxu0  ;;  %1022 = vmatmul.mubr.f32.vlgmr.msra.gmra.mxu1 %v626_v17  ;;  %v628_v37 = vmax.f32 %v604_v19, 0.0 }
 0x100   : > { %v815_v25 = vadd.f32 %v814_v15, %v813_v6  ;;  %v823_v26 = vrot.slane %v822_v16, 2  ;;  %v784_v28 = vadd.f32 %v783_v22, %v782_v11  ;;  %v629_v30 = vmax.f32 %v606_v23, 0.0 }
 0x101   : > { %v776_v27 = vrot.slane %v775_v21, 2  ;;  %v610_v39 = vadd.f32 %v609_v33, %v1758_v32  ;;  %v611_v40 = vpop.f32.mrf.mxu0 }
 0x102   : > { %v816_v31 = vrot.slane %v815_v25, 1  ;;  %v824_v36 = vadd.f32 %v823_v26, %v822_v16  ;;  %v785_v42 = vrot.slane %v784_v28, 2  ;;  %v612_v44 = vadd.f32 %v611_v40, %v1758_v32  ;;  %1026 = vmatprep.mubr.f32.mxu1 %v629_v30 }
 0x103   : > { %v777_v41 = vadd.f32 %v776_v27, %v775_v21  ;;  %v613_v47 = vpop.f32.mrf.mxu0  ;;  %1027 = vmatmul.mubr.f32.gmra.mxu1 %v628_v37  ;;  %v630_v56 = vmax.f32 %v610_v39, 0.0 }
 0x104   : > { %v817_v35 = vadd.f32 %v816_v31, %v815_v25  ;;  %v825_v46 = vrot.slane %v824_v36, 1  ;;  %v786_v51 = vadd.f32 %v785_v42, %v784_v28  ;;  %v631_v52 = vmax.f32 %v612_v44, 0.0 }
 0x105   : > { %v778_v49 = vrot.slane %v777_v41, 1  ;;  %v614_v57 = vadd.f32 %v613_v47, %v1762_v34  ;;  %v615_v59 = vpop.f32.mrf.mxu0 }
 0x106   : > { %v827_v54 = vadd.f32 1e-10, %v817_v35  ;;  %v826_v55 = vadd.f32 %v825_v46, %v824_v36  ;;  %v787_v61 = vrot.slane %v786_v51, 1  ;;  %v616_v63 = vadd.f32 %v615_v59, %v1762_v34  ;;  %1031 = vmatprep.mubr.f32.mxu1 %v631_v52 }
 0x107   : > { %v779_v60 = vadd.f32 %v778_v49, %v777_v41  ;;  %1032 = vmatmul.mubr.f32.gmra.mxu1 %v630_v56  ;;  %v632_v5 = vmax.f32 %v614_v57, 0.0 }
 0x108   : > { %v828_v32 = vadd.f32 1e-10, %v826_v55  ;;  %1466 = vrsqrt.f32 %v827_v54  ;;  %v788_v1 = vadd.f32 %v787_v61, %v786_v51  ;;  %v633_v4 = vmax.f32 %v616_v63, 0.0 }
 0x109   : > { %v789_v0 = vadd.f32 1e-10, %v779_v60 }
 0x10a   : > { %1468 = vrsqrt.f32 %v828_v32  ;;  %v790_v6 = vadd.f32 1e-10, %v788_v1  ;;  %1036 = vmatprep.mubr.f32.mxu1 %v633_v4 }
 0x10b   : > { %1470 = vrsqrt.f32 %v789_v0  ;;  %1037 = vmatmul.mubr.f32.gmra.mxu1 %v632_v5 }
 0x10c   : > { %1472 = vrsqrt.f32 %v790_v6 }
 0x115   : > { %v1467_v7 = vpop.eup %1466 }
 0x116   : > { %v831_v14 = vmul.f32 %v1467_v7, %v1766_v45  ;;  %v837_v36 = vmul.f32 %v1467_v7, %v1804_v29 }
 0x117   : > { %v1469_v8 = vpop.eup %1468 }
 0x118   : > { %v1471_v10 = vpop.eup %1470  ;;  %v832_v16 = vmul.f32 %v1469_v8, %v1768_v50  ;;  %v834_v19 = vmul.f32 %v1469_v8, %v1776_v62  ;;  %v836_v45 = vmul.f32 %v1469_v8, %v1794_v18  ;;  %v838_v28 = vmul.f32 %v1469_v8, %v1816_v43  ;;  %v1079_v8 = vld [vmem:[%s1920_s7] sm:$0x3] }
 0x119   : > { %v793_v11 = vmul.f32 %v1471_v10, %v1780_v2  ;;  %v1473_v34 = vpop.eup %1472  ;;  %v795_v21 = vmul.f32 %v1471_v10, %v1782_v3  ;;  %v833_v2 = vmul.f32 %v1467_v7, %v1770_v53  ;;  %v797_v50 = vmul.f32 %v1471_v10, %v1800_v24 }
 0x11a   : > { %v794_v15 = vmul.f32 %v1473_v34, %v1788_v12  ;;  %v796_v17 = vmul.f32 %v1473_v34, %v1790_v13  ;;  %v798_v25 = vmul.f32 %v1473_v34, %v1810_v38  ;;  %v800_v13 = vmul.f32 %v1473_v34, %v1826_v58 }
 0x11b   : > { %v839_v20 = vsub.f32 %v793_v11, %v831_v14  ;;  %v841_v12 = vsub.f32 %v795_v21, %v833_v2  ;;  %v835_v3 = vmul.f32 %v1467_v7, %v1786_v9  ;;  %v799_v53 = vmul.f32 %v1471_v10, %v1820_v48 }
 0x11c   : > { %v840_v22 = vsub.f32 %v794_v15, %v832_v16  ;;  %v842_v23 = vsub.f32 %v796_v17, %v834_v19  ;;  %v844_v27 = vsub.f32 %v798_v25, %v836_v45  ;;  %v846_v31 = vsub.f32 %v800_v13, %v838_v28  ;;  %v1055_v28 = vld [vmem:[%s1919_s6 + $0x10] sm:$0xff] }
 0x11d   : > { %v847_v33 = vmul.f32 %v839_v20, %v839_v20  ;;  %v849_v38 = vmul.f32 %v841_v12, %v841_v12  ;;  %v843_v30 = vsub.f32 %v797_v50, %v835_v3  ;;  %v845_v58 = vsub.f32 %v799_v53, %v837_v36  ;;  %v1053_v3 = vld [vmem:[%s1919_s6] sm:$0xff] }
 0x11e   : > { %v848_v26 = vmul.f32 %v840_v22, %v840_v22  ;;  %v850_v62 = vmul.f32 %v842_v23, %v842_v23  ;;  %v852_v18 = vmul.f32 %v844_v27, %v844_v27  ;;  %v854_v37 = vmul.f32 %v846_v31, %v846_v31 }
 0x11f   : > { %v851_v24 = vmul.f32 %v843_v30, %v843_v30  ;;  %v853_v39 = vmul.f32 %v845_v58, %v845_v58  ;;  %v1516_v9 = vmov 0.0  }
 0x120   : > { %923 = vmatprep.mubr.f32.mxu0 %v848_v26  ;;  %428 = vst.msk [vmem:[#allocation3] sm:$0xff] %vm423_vm1, %v1516_v9  ;;  %424 = vst.msk [vmem:[#allocation2] sm:$0xff] %vm423_vm1, %v1516_v9  ;;  %1391 = vmatprep.subr.mxu0 %v1516_v9 }
 0x121   : > { %924 = vmatmul.mubr.f32.vlgmr.msra.gmra.mxu0 %v847_v33  ;;  %425 = vst.msk [vmem:[#allocation2 + $0x8] sm:$0xff] %vm423_vm1, %v1516_v9  ;;  %426 = vst.msk [vmem:[#allocation2 + $0x10] sm:$0xff] %vm423_vm1, %v1516_v9 }
 0x122   : > { %928 = vmatprep.mubr.f32.mxu0 %v850_v62  ;;  %427 = vst.msk [vmem:[#allocation2 + $0x18] sm:$0xff] %vm423_vm1, %v1516_v9  ;;  %429 = vst.msk [vmem:[#allocation3 + $0x8] sm:$0xff] %vm423_vm1, %v1516_v9  ;;  %v1054_v62 = vld [vmem:[%s1919_s6 + $0x8] sm:$0xff] }
 0x123   : > { %430 = vst.msk [vmem:[#allocation3 + $0x10] sm:$0xff] %vm423_vm1, %v1516_v9  ;;  %431 = vst.msk [vmem:[#allocation3 + $0x18] sm:$0xff] %vm423_vm1, %v1516_v9 }
 0x125   : > { %929 = vmatmul.mubr.f32.gmra.mxu0 %v849_v38 }
 0x126   : > { %933 = vmatprep.mubr.f32.mxu0 %v852_v18  ;;  %v1056_v18 = vld [vmem:[%s1919_s6 + $0x18] sm:$0xff] }
 0x127   : > { %v953_v43 = vld [vmem:[#allocation3] sm:$0xff] }
 0x128   : > { %v855_v11 = vld [vmem:[#allocation2] sm:$0xff]  ;;  %v856_v17 = vld [vmem:[#allocation2 + $0x8] sm:$0xff]  ;;  %v857_v23 = vld [vmem:[#allocation2 + $0x10] sm:$0xff] }
 0x129   : > { %934 = vmatmul.mubr.f32.gmra.mxu0 %v851_v24  ;;  %v954_v44 = vld [vmem:[#allocation3 + $0x8] sm:$0xff]  ;;  %v858_v33 = vld [vmem:[#allocation2 + $0x18] sm:$0xff] }
 0x12a   : > { %938 = vmatprep.mubr.f32.mxu0 %v854_v37  ;;  %v955_v51 = vld [vmem:[#allocation3 + $0x10] sm:$0xff]  ;;  %v956_v57 = vld [vmem:[#allocation3 + $0x18] sm:$0xff] }
 0x12d   : > { %939 = vmatmul.mubr.f32.gmra.mxu0 %v853_v39 }
 0x12e   : > { %1399 = vmatprep.mubr.msk.f32.mxu0 %vm1517_vm2, %v1516_v9 }
 0x1bf   : > { %v1374_v29 = vpop.f32.mrf.mxu1 }
 0x1c1   : > { %v1375_v48 = vpop.f32.mrf.mxu1 }
 0x1c2   : > { %v1376_v40 = vadd.f32 %v1375_v48, %v1374_v29 }
 0x1c3   : > { %v1377_v41 = vpop.f32.mrf.mxu1 }
 0x1c4   : > { %v1042_v42 = vadd.f32 %v1376_v40, %v953_v43 }
 0x1c5   : > { %v1378_v35 = vpop.f32.mrf.mxu1 }
 0x1c6   : > { %1046 = vst.msk [vmem:[#allocation3] sm:$0xff] %vm423_vm1, %v1042_v42  ;;  %v1379_v46 = vadd.f32 %v1378_v35, %v1377_v41 }
 0x1c7   : > { %v1380_v47 = vpop.f32.mrf.mxu1 }
 0x1c8   : > { %v1043_v49 = vadd.f32 %v1379_v46, %v954_v44 }
 0x1c9   : > { %v1381_v52 = vpop.f32.mrf.mxu1 }
 0x1ca   : > { %1047 = vst.msk [vmem:[#allocation3 + $0x8] sm:$0xff] %vm423_vm1, %v1043_v49  ;;  %v1382_v54 = vadd.f32 %v1381_v52, %v1380_v47  ;;  %v1088_v47 = vld [vmem:[%s1921_s8] sm:$0x3] }
 0x1cb   : > { %v1383_v55 = vpop.f32.mrf.mxu1 }
 0x1cc   : > { %v1044_v56 = vadd.f32 %v1382_v54, %v955_v51 }
 0x1cd   : > { %v1384_v59 = vpop.f32.mrf.mxu1  ;;  %v1080_v5 = vld [vmem:[#allocation3] sm:$0xff] }
 0x1ce   : > { %1048 = vst.msk [vmem:[#allocation3 + $0x10] sm:$0xff] %vm423_vm1, %v1044_v56  ;;  %v1385_v60 = vadd.f32 %v1384_v59, %v1383_v55  ;;  %v1084_v7 = vmul.f32 0.00390625, %v1080_v5 }
 0x1d0   : > { %v1045_v61 = vadd.f32 %v1385_v60, %v956_v57  ;;  %v1169_v60 = vlaneseq }
 0x1d1   : > { %v1081_v1 = vld [vmem:[#allocation3 + $0x8] sm:$0xff] }
 0x1d2   : > { %1049 = vst.msk [vmem:[#allocation3 + $0x18] sm:$0xff] %vm423_vm1, %v1045_v61  ;;  %v1085_v6 = vmul.f32 0.00390625, %v1081_v1  ;;  %v1170_v61 = vand.u32 127, %v1169_v60 }
 0x1d4   : > { %vm1171_vm5 = vcmp.eq.s32.totalorder %v1170_v61, 0 }
 0x1d5   : > { %v1082_v32 = vld [vmem:[#allocation3 + $0x10] sm:$0xff] }
 0x1d6   : > { %v1086_v4 = vmul.f32 0.00390625, %v1082_v32 }
 0x1d9   : > { %v1083_v63 = vld [vmem:[#allocation3 + $0x18] sm:$0xff] }
 0x1da   : > { %v1087_v0 = vmul.f32 0.00390625, %v1083_v63 }
 0x1dc   : > { %1392 = vmatpush3.msra.mxu0 %v1087_v0 }
 0x1dd   : > { %1393 = vmatprep.subr.mxu0 %v1516_v9 }
 0x1de   : > { %1394 = vmatpush3.msra.mxu0 %v1086_v4 }
 0x1df   : > { %1395 = vmatprep.subr.mxu0 %v1516_v9 }
 0x1e0   : > { %1396 = vmatpush3.msra.mxu0 %v1085_v6 }
 0x1e1   : > { %v1330_v10 = vpop.f32.mrf.mxu0  ;;  %1397 = vmatprep.subr.mxu0 %v1516_v9 }
 0x1e2   : > { %1398 = vmatpush3.msra.mxu0 %v1084_v7 }
 0x1e3   : > { %v1331_v34 = vpop.f32.mrf.mxu0  ;;  %1400 = vmatmul.mubr.msk.f32.vlgmr.msra.gmra.mxu0 %vm532_vm0, %v1079_v8 }
 0x1e4   : > { %v1332_v14 = vadd.f32 %v1331_v34, %v1330_v10 }
 0x1e5   : > { %v1333_v15 = vpop.f32.mrf.mxu0 }
 0x1e6   : > { %v944_v16 = vadd.f32 %v1332_v14, %v855_v11 }
 0x1e7   : > { %v1334_v19 = vpop.f32.mrf.mxu0 }
 0x1e8   : > { %949 = vst.msk [vmem:[#allocation2] sm:$0xff] %vm423_vm1, %v944_v16  ;;  %v1335_v20 = vadd.f32 %v1334_v19, %v1333_v15 }
 0x1e9   : > { %v1336_v21 = vpop.f32.mrf.mxu0 }
 0x1ea   : > { %v945_v22 = vadd.f32 %v1335_v20, %v856_v17 }
 0x1eb   : > { %v1337_v25 = vpop.f32.mrf.mxu0 }
 0x1ec   : > { %950 = vst.msk [vmem:[#allocation2 + $0x8] sm:$0xff] %vm423_vm1, %v945_v22  ;;  %v1338_v2 = vadd.f32 %v1337_v25, %v1336_v21 }
 0x1ed   : > { %v1339_v26 = vpop.f32.mrf.mxu0 }
 0x1ee   : > { %v946_v45 = vadd.f32 %v1338_v2, %v857_v23 }
 0x1ef   : > { %v1340_v12 = vpop.f32.mrf.mxu0  ;;  %v1057_v53 = vld [vmem:[#allocation2] sm:$0xff] }
 0x1f0   : > { %951 = vst.msk [vmem:[#allocation2 + $0x10] sm:$0xff] %vm423_vm1, %v946_v45  ;;  %v1341_v50 = vadd.f32 %v1340_v12, %v1339_v26  ;;  %v1061_v36 = vmul.f32 %v1057_v53, %v1053_v3 }
 0x1f2   : > { %v947_v13 = vadd.f32 %v1341_v50, %v858_v33  ;;  %v1065_v39 = vsel %vm423_vm1, %v1061_v36, 0.0 }
 0x1f3   : > { %v1058_v27 = vld [vmem:[#allocation2 + $0x8] sm:$0xff] }
 0x1f4   : > { %952 = vst.msk [vmem:[#allocation2 + $0x18] sm:$0xff] %vm423_vm1, %v947_v13  ;;  %v1062_v30 = vmul.f32 %v1058_v27, %v1054_v62 }
 0x1f6   : > { %v1066_v37 = vsel %vm423_vm1, %v1062_v30, 0.0 }
 0x1f7   : > { %v1059_v38 = vld [vmem:[#allocation2 + $0x10] sm:$0xff]  ;;  %v1067_v29 = vadd.f32 %v1066_v37, %v1065_v39 }
 0x1f8   : > { %v1063_v24 = vmul.f32 %v1059_v38, %v1055_v28 }
 0x1fa   : > { %v1068_v9 = vsel %vm423_vm1, %v1063_v24, 0.0 }
 0x1fb   : > { %v1060_v31 = vld [vmem:[#allocation2 + $0x18] sm:$0xff]  ;;  %v1069_v48 = vadd.f32 %v1068_v9, %v1067_v29 }
 0x1fc   : > { %v1064_v58 = vmul.f32 %v1060_v31, %v1056_v18 }
 0x1fe   : > { %v1070_v43 = vsel %vm423_vm1, %v1064_v58, 0.0 }
 0x1ff   : > { %v1071_v40 = vadd.f32 %v1070_v43, %v1069_v48 }
 0x201   : > { %v1072_v41 = vrot.slane %v1071_v40, 4 }
 0x203   : > { %v1073_v42 = vadd.f32 %v1072_v41, %v1071_v40 }
 0x205   : > { %v1074_v44 = vrot.slane %v1073_v42, 2 }
 0x207   : > { %v1075_v35 = vadd.f32 %v1074_v44, %v1073_v42 }
 0x209   : > { %v1076_v46 = vrot.slane %v1075_v35, 1 }
 0x20b   : > { %v1077_v49 = vadd.f32 %v1076_v46, %v1075_v35 }
 0x20d   : > { %v1078_v56 = vmul.f32 0.00390625, %v1077_v49 }
 0x2a3   : > { %v1158_v51 = vpop.f32.mrf.mxu0 }
 0x2a4   : > { %v1159_v52 = vadd.f32 %v1158_v51, %v1088_v47 }
 0x2a5   : > { %v1401_v54 = vpop.f32.mrf.mxu0 }
 0x2a6   : > { %v1163_v55 = vrot.slane %v1159_v52, 7 }
 0x2a8   : > { %v1166_v57 = vsel %vm1165_vm3, %v1078_v56, %v1163_v55 }
 0x2a9   : > { %v1168_v59 = vsel %vm1167_vm4, %v1166_v57, 0.0 }
 0x2aa   : > { %1174 = vperm.xlu0 %1446, %v1168_v59  }
 0x325   : > { %v1175_v63 = vpop.permute.xlu0 %1174 }
 0x326   : > { %v1177_v32 = vsel %vm1171_vm5, %v1175_v63, 0.0 }
 0x327   : > { %1178 = vst [vmem:[%s417_s27] sm:$0xff] %v1177_v32 }
 0x328 PF: > { %s19_s13 = sadd.s32 1, %s1512_s13   ;;  %s1923_s30 = smov %s1500_s10 }
 0x329   : > { %p16_p10 = scmp.ge.s32.totalorder %s19_s13, 4   ;;  %s1924_s10 = smov %s1603_s17 }
 0x32a   : > { %s1925_s11 = smov %s1508_s12  ;;  %s1926_s12 = smov %s1928_s14 }
 0x32b   :  { %18 = sbr.rel (!%p16_p10) target bundleno = 3 (0x3), region = 140 }

</bundles_post_ra>
